<compile_context>
chip_gen: v6e
topology: v6e:2x2x1
jax: 0.10.0
libtpu: 0.0.40
codegen_flags: <defaults>
</compile_context>

<pallas_src>
import jax
import jax.numpy as jnp
from jax import lax
from jax.experimental import pallas as pl
from jax.experimental.pallas import tpu as pltpu

_NEG = -1.0e30   # plain Python float: lowers as an immediate (no captured constant)


def _round_up(n, m):
    return ((n + m - 1) // m) * m


def self_attention_pallas(x, wq, bq, wk, bk, wv, bv, *, block_l=128):
    B, C, H, W = x.shape
    L = H * W
    C8 = wq.shape[0]
    C8p = _round_up(C8, 8)           # padded rows of the C//8 projections
    Cp = _round_up(C, 8)             # padded rows of the value projection
    FH = C8p + Cp                    # rows of the fused f/h (key+value) projection
    R = 2 * C8p + Cp                 # total stacked-weight rows
    T = block_l
    Lp = _round_up(L, T)             # length padded to a lane-dense multiple of 128
    nj = Lp // T
    ni = Lp // T
    needs_mask = (Lp != L)

    # ---- host-side prep: flatten spatial, pad length, stack+pad weights, cast bf16 ----
    x_flat = x.reshape(B, C, L)
    if needs_mask:
        x_flat = jnp.pad(x_flat, ((0, 0), (0, 0), (0, Lp - L)))
    x_bf = x_flat.astype(jnp.bfloat16)

    def _seg(w, b, rows):
        r = w.shape[0]
        return jnp.pad(w, ((0, rows - r), (0, 0))), jnp.pad(b, ((0, rows - r),))

    wq_p, bq_p = _seg(wq, bq, C8p)    # rows [0, C8p)         -> f  (keys)
    wv_p, bv_p = _seg(wv, bv, Cp)     # rows [C8p, C8p+Cp)    -> h  (values)
    wk_p, bk_p = _seg(wk, bk, C8p)    # rows [FH, R)          -> g  (queries)
    w_stack = jnp.concatenate([wq_p, wv_p, wk_p], axis=0).astype(jnp.bfloat16)   # (R, C)
    b_stack = jnp.concatenate([bq_p, bv_p, bk_p], axis=0).reshape(R, 1).astype(jnp.float32)

    # ---- kernel ----
    def kernel(xj_ref, xi_ref, w_ref, b_ref, o_ref, g_scr, m_scr, l_scr, acc_scr):
        i = pl.program_id(2)

        @pl.when(i == 0)
        def _init():
            m_scr[...] = jnp.full_like(m_scr, _NEG)
            l_scr[...] = jnp.zeros_like(l_scr)
            acc_scr[...] = jnp.zeros_like(acc_scr)
            # query-side projection g = Wk @ x[:, j_tile] + bk (once per column tile)
            g = jnp.dot(w_ref[pl.ds(FH, C8p), :], xj_ref[0],
                        preferred_element_type=jnp.float32) + b_ref[pl.ds(FH, C8p), :]
            g_scr[...] = g.astype(jnp.bfloat16)

        # fused key/value projections for this key tile: one stacked MXU matmul
        fh = jnp.dot(w_ref[pl.ds(0, FH), :], xi_ref[0],
                     preferred_element_type=jnp.float32) + b_ref[pl.ds(0, FH), :]
        f = fh[:C8p].astype(jnp.bfloat16)          # (C8p, T) keys   (padded rows are 0)
        h = fh[C8p:].astype(jnp.bfloat16)          # (Cp,  T) values (padded rows are 0)

        # scores s[i', j'] = sum_c f[c, i'] * g[c, j'] -> (T_keys, T_queries)
        s = lax.dot_general(f, g_scr[...], (((0,), (0,)), ((), ())),
                            preferred_element_type=jnp.float32)
        if needs_mask:
            key_pos = i * T + lax.broadcasted_iota(jnp.int32, (T, T), 0)
            s = jnp.where(key_pos < L, s, _NEG)

        # online softmax over key (axis-0) blocks; running stats are per query column
        m_prev = m_scr[...]                                        # (1, T)
        m_new = jnp.maximum(m_prev, jnp.max(s, axis=0, keepdims=True))
        alpha = jnp.exp(m_prev - m_new)                            # (1, T) f32
        p = jnp.exp(s - m_new)                                     # (T, T) f32
        l_scr[...] = alpha * l_scr[...] + jnp.sum(p, axis=0, keepdims=True)
        acc_scr[...] = alpha * acc_scr[...] + jnp.dot(
            h, p.astype(jnp.bfloat16), preferred_element_type=jnp.float32)
        m_scr[...] = m_new

        @pl.when(i == pl.num_programs(2) - 1)
        def _finalize():
            inv_l = pl.reciprocal(l_scr[...], approx=True)         # (1, T)
            out = acc_scr[...] * inv_l                             # (Cp, T) f32
            o_ref[0] = out[:C].astype(o_ref.dtype)

    # ---- VMEM budget (double-buffered in/out tiles + scratch), explicit limit ----
    out_itemsize = jnp.dtype(x.dtype).itemsize
    per_block = (2 * C * T * 2            # two bf16 x tiles
                 + R * C * 2 + R * 4      # stacked weights (bf16) + bias (f32)
                 + C * T * out_itemsize)  # output tile
    scratch_bytes = C8p * T * 2 + 2 * T * 4 + Cp * T * 4
    vmem_limit = int(min(max(4 * per_block + 2 * scratch_bytes, 16 << 20), 64 << 20))

    out = pl.pallas_call(
        kernel,
        out_shape=jax.ShapeDtypeStruct((B, C, Lp), x.dtype),
        grid_spec=pltpu.PrefetchScalarGridSpec(
            num_scalar_prefetch=0,
            grid=(B, nj, ni),
            in_specs=[
                pl.BlockSpec((1, C, T), lambda b, j, i: (b, 0, j)),   # x, query columns
                pl.BlockSpec((1, C, T), lambda b, j, i: (b, 0, i)),   # x, key/value columns
                pl.BlockSpec((R, C), lambda b, j, i: (0, 0)),         # stacked weights
                pl.BlockSpec((R, 1), lambda b, j, i: (0, 0)),         # stacked bias
            ],
            out_specs=pl.BlockSpec((1, C, T), lambda b, j, i: (b, 0, j)),
            scratch_shapes=[
                pltpu.VMEM((C8p, T), jnp.bfloat16),   # g (queries) for current column tile
                pltpu.VMEM((1, T), jnp.float32),      # running max
                pltpu.VMEM((1, T), jnp.float32),      # running sum
                pltpu.VMEM((Cp, T), jnp.float32),     # output accumulator
            ],
        ),
        compiler_params=pltpu.CompilerParams(
            dimension_semantics=("parallel", "parallel", "arbitrary"),
            vmem_limit_bytes=vmem_limit,
        ),
    )(x_bf, x_bf, w_stack, b_stack)

    return out[:, :, :L].reshape(B, C, H, W)


def self_attention_ref(x, wq, bq, wk, bk, wv, bv):
    """Pure-JAX f32 reference mirroring the PyTorch forward."""
    B, C, H, W = x.shape
    L = H * W
    xf = x.reshape(B, C, L).astype(jnp.float32)
    f = jnp.einsum("oc,bcl->bol", wq, xf) + bq[None, :, None]
    g = jnp.einsum("oc,bcl->bol", wk, xf) + bk[None, :, None]
    h = jnp.einsum("oc,bcl->bol", wv, xf) + bv[None, :, None]
    s = jnp.einsum("bil,bij->blj", f, g)          # f^T @ g : (B, L, L)
    beta = jax.nn.softmax(s, axis=1)              # torch dim=1 (over f positions)
    o = jnp.einsum("bcl,blj->bcj", h, beta)
    return o.reshape(B, C, H, W)


if __name__ == "__main__":
    def run_case(key, B, C, H, W):
        C8 = C // 8
        kx, kq, kbq, kk, kbk, kv, kbv = jax.random.split(key, 7)
        x = jax.random.normal(kx, (B, C, H, W), dtype=jnp.float32)
        # Conv1d(k=1) weights: (out_channels, in_channels); biases: (out_channels,)
        wq = jax.random.normal(kq, (C8, C), dtype=jnp.float32) * 0.1
        bq = jax.random.normal(kbq, (C8,), dtype=jnp.float32) * 0.1
        wk = jax.random.normal(kk, (C8, C), dtype=jnp.float32) * 0.1
        bk = jax.random.normal(kbk, (C8,), dtype=jnp.float32) * 0.1
        wv = jax.random.normal(kv, (C, C), dtype=jnp.float32) * 0.1
        bv = jax.random.normal(kbv, (C,), dtype=jnp.float32) * 0.1

        out = jax.block_until_ready(self_attention_pallas(x, wq, bq, wk, bk, wv, bv))
        ref = self_attention_ref(x, wq, bq, wk, bk, wv, bv)
        assert out.shape == (B, C, H, W)
        # bf16 MXU operands -> looser tolerance than the all-f32 version
        assert jnp.allclose(out, ref, atol=3e-2, rtol=3e-2), (
            f"mismatch vs JAX reference, max abs err {jnp.max(jnp.abs(out - ref))}")

    key = jax.random.PRNGKey(0)
    k1, k2 = jax.random.split(key)
    run_case(k1, B=2, C=16, H=16, W=16)   # L=256: 2x2 column/key tile grid, multi-step online softmax
    run_case(k2, B=1, C=32, H=9, W=10)    # L=90: exercises length padding + key masking
    print("KERNEL_OK")
</pallas_src>

<mosaic_0001>
module attributes {stable_mosaic.version = 11 : i64} {
  func.func @kernel(%arg0: i32, %arg1: i32, %arg2: i32, %arg3: memref<1x16x128xbf16, #tpu.memory_space<vmem>>, %arg4: memref<1x16x128xbf16, #tpu.memory_space<vmem>>, %arg5: memref<32x16xbf16, #tpu.memory_space<vmem>>, %arg6: memref<32x1xf32, #tpu.memory_space<vmem>>, %arg7: memref<1x16x128xf32, #tpu.memory_space<vmem>>, %arg8: memref<8x128xbf16, #tpu.memory_space<vmem>>, %arg9: memref<1x128xf32, #tpu.memory_space<vmem>>, %arg10: memref<1x128xf32, #tpu.memory_space<vmem>>, %arg11: memref<16x128xf32, #tpu.memory_space<vmem>>) attributes {dimension_semantics = [#tpu.dimension_semantics<parallel>, #tpu.dimension_semantics<parallel>, #tpu.dimension_semantics<arbitrary>], iteration_bounds = array<i64: 2, 2, 2>, scalar_prefetch = 0 : i64, scratch_operands = 4 : i64, tpu.core_type = #tpu.core_type<tc>, window_params = [{transform_indices = @transform_0, window_bounds = array<i64: 1, 16, 128>}, {transform_indices = @transform_1, window_bounds = array<i64: 1, 16, 128>}, {pipeline_mode = #tpu.pipeline_mode<synchronous>, transform_indices = @transform_2, window_bounds = array<i64: 32, 16>}, {pipeline_mode = #tpu.pipeline_mode<synchronous>, transform_indices = @transform_3, window_bounds = array<i64: 32, 1>}, {transform_indices = @transform_4, window_bounds = array<i64: 1, 16, 128>}]} {
    %c0_i32 = arith.constant 0 : i32
    %0 = arith.cmpi eq, %arg2, %c0_i32 : i32
    %1 = arith.extui %0 : i1 to i32
    %c0_i32_0 = arith.constant 0 : i32
    %2 = arith.cmpi ne, %1, %c0_i32_0 : i32
    scf.if %2 {
      %cst_26 = arith.constant -1.000000e+30 : f32
      %42 = vector.broadcast %cst_26 : f32 to vector<1x128xf32>
      %c0_27 = arith.constant 0 : index
      %c0_28 = arith.constant 0 : index
      %43 = vector.load %arg9[%c0_27, %c0_28] : memref<1x128xf32, #tpu.memory_space<vmem>>, vector<1x128xf32>
      tpu.vector_store %arg9[%c0_27, %c0_28], %42 {strides = array<i32>} : memref<1x128xf32, #tpu.memory_space<vmem>>, vector<1x128xf32>,
      %cst_29 = arith.constant 0.000000e+00 : f32
      %44 = vector.broadcast %cst_29 : f32 to vector<1x128xf32>
      %c0_30 = arith.constant 0 : index
      %c0_31 = arith.constant 0 : index
      %45 = vector.load %arg10[%c0_30, %c0_31] : memref<1x128xf32, #tpu.memory_space<vmem>>, vector<1x128xf32>
      tpu.vector_store %arg10[%c0_30, %c0_31], %44 {strides = array<i32>} : memref<1x128xf32, #tpu.memory_space<vmem>>, vector<1x128xf32>,
      %cst_32 = arith.constant 0.000000e+00 : f32
      %46 = vector.broadcast %cst_32 : f32 to vector<16x128xf32>
      %c0_33 = arith.constant 0 : index
      %c0_34 = arith.constant 0 : index
      %47 = vector.load %arg11[%c0_33, %c0_34] : memref<16x128xf32, #tpu.memory_space<vmem>>, vector<16x128xf32>
      tpu.vector_store %arg11[%c0_33, %c0_34], %46 {strides = array<i32>} : memref<16x128xf32, #tpu.memory_space<vmem>>, vector<16x128xf32>,
      %c24 = arith.constant 24 : index
      %c0_35 = arith.constant 0 : index
      %48 = vector.load %arg5[%c24, %c0_35] : memref<32x16xbf16, #tpu.memory_space<vmem>>, vector<8x16xbf16>
      %c0_36 = arith.constant 0 : index
      %c0_37 = arith.constant 0 : index
      %c0_38 = arith.constant 0 : index
      %49 = vector.load %arg3[%c0_36, %c0_37, %c0_38] : memref<1x16x128xbf16, #tpu.memory_space<vmem>>, vector<1x16x128xbf16>
      %50 = vector.shape_cast %49 : vector<1x16x128xbf16> to vector<16x128xbf16>
      %cst_39 = arith.constant dense<0.000000e+00> : vector<8x128xf32>
      %51 = tpu.matmul %48, %50, %cst_39 {dimension_numbers = #tpu.dot_dimension_numbers<[1], [0], [0], [1], [0, 0, 1, 1], [], []>} : vector<8x16xbf16>, vector<16x128xbf16>, vector<8x128xf32> -> vector<8x128xf32>
      %c24_40 = arith.constant 24 : index
      %c0_41 = arith.constant 0 : index
      %52 = vector.load %arg6[%c24_40, %c0_41] : memref<32x1xf32, #tpu.memory_space<vmem>>, vector<8x1xf32>
      %53 = vector.broadcast %52 : vector<8x1xf32> to vector<8x128xf32>
      %54 = arith.addf %51, %53 : vector<8x128xf32>
      %55 = arith.truncf %54 : vector<8x128xf32> to vector<8x128xbf16>
      %c0_42 = arith.constant 0 : index
      %c0_43 = arith.constant 0 : index
      %56 = vector.load %arg8[%c0_42, %c0_43] : memref<8x128xbf16, #tpu.memory_space<vmem>>, vector<8x128xbf16>
      tpu.vector_store %arg8[%c0_42, %c0_43], %55 {strides = array<i32>} : memref<8x128xbf16, #tpu.memory_space<vmem>>, vector<8x128xbf16>,
    } else {
    }
    %c0 = arith.constant 0 : index
    %c0_1 = arith.constant 0 : index
    %3 = vector.load %arg5[%c0, %c0_1] : memref<32x16xbf16, #tpu.memory_space<vmem>>, vector<24x16xbf16>
    %c0_2 = arith.constant 0 : index
    %c0_3 = arith.constant 0 : index
    %c0_4 = arith.constant 0 : index
    %4 = vector.load %arg4[%c0_2, %c0_3, %c0_4] : memref<1x16x128xbf16, #tpu.memory_space<vmem>>, vector<1x16x128xbf16>
    %5 = vector.shape_cast %4 : vector<1x16x128xbf16> to vector<16x128xbf16>
    %cst = arith.constant dense<0.000000e+00> : vector<24x128xf32>
    %6 = tpu.matmul %3, %5, %cst {dimension_numbers = #tpu.dot_dimension_numbers<[1], [0], [0], [1], [0, 0, 1, 1], [], []>} : vector<24x16xbf16>, vector<16x128xbf16>, vector<24x128xf32> -> vector<24x128xf32>
    %c0_5 = arith.constant 0 : index
    %c0_6 = arith.constant 0 : index
    %7 = vector.load %arg6[%c0_5, %c0_6] : memref<32x1xf32, #tpu.memory_space<vmem>>, vector<24x1xf32>
    %8 = vector.broadcast %7 : vector<24x1xf32> to vector<24x128xf32>
    %9 = arith.addf %6, %8 : vector<24x128xf32>
    %10 = vector.extract_strided_slice %9 {offsets = [0, 0], sizes = [8, 128], strides = [1, 1]} : vector<24x128xf32> to vector<8x128xf32>
    %11 = arith.truncf %10 : vector<8x128xf32> to vector<8x128xbf16>
    %12 = vector.extract_strided_slice %9 {offsets = [8, 0], sizes = [16, 128], strides = [1, 1]} : vector<24x128xf32> to vector<16x128xf32>
    %13 = arith.truncf %12 : vector<16x128xf32> to vector<16x128xbf16>
    %c0_7 = arith.constant 0 : index
    %c0_8 = arith.constant 0 : index
    %14 = vector.load %arg8[%c0_7, %c0_8] : memref<8x128xbf16, #tpu.memory_space<vmem>>, vector<8x128xbf16>
    %cst_9 = arith.constant dense<0.000000e+00> : vector<128x128xf32>
    %15 = tpu.matmul %11, %14, %cst_9 {dimension_numbers = #tpu.dot_dimension_numbers<[0], [0], [1], [1], [0, 1, 1, 1], [], []>} : vector<8x128xbf16>, vector<8x128xbf16>, vector<128x128xf32> -> vector<128x128xf32>
    %c0_10 = arith.constant 0 : index
    %c0_11 = arith.constant 0 : index
    %16 = vector.load %arg9[%c0_10, %c0_11] : memref<1x128xf32, #tpu.memory_space<vmem>>, vector<1x128xf32>
    %cst_12 = arith.constant dense<0xFF800000> : vector<128xf32>
    %17 = vector.multi_reduction <maximumf>, %15, %cst_12 [0] : vector<128x128xf32> to vector<128xf32>
    %18 = vector.shape_cast %17 : vector<128xf32> to vector<1x128xf32>
    %19 = arith.maximumf %16, %18 : vector<1x128xf32>
    %20 = arith.subf %16, %19 : vector<1x128xf32>
    %21 = math.exp %20 : vector<1x128xf32>
    %22 = vector.broadcast %19 : vector<1x128xf32> to vector<128x128xf32>
    %23 = arith.subf %15, %22 : vector<128x128xf32>
    %24 = math.exp %23 : vector<128x128xf32>
    %c0_13 = arith.constant 0 : index
    %c0_14 = arith.constant 0 : index
    %25 = vector.load %arg10[%c0_13, %c0_14] : memref<1x128xf32, #tpu.memory_space<vmem>>, vector<1x128xf32>
    %26 = arith.mulf %21, %25 : vector<1x128xf32>
    %cst_15 = arith.constant dense<0.000000e+00> : vector<128xf32>
    %27 = vector.multi_reduction <add>, %24, %cst_15 [0] : vector<128x128xf32> to vector<128xf32>
    %28 = vector.shape_cast %27 : vector<128xf32> to vector<1x128xf32>
    %29 = arith.addf %26, %28 : vector<1x128xf32>
    %c0_16 = arith.constant 0 : index
    %c0_17 = arith.constant 0 : index
    %30 = vector.load %arg10[%c0_16, %c0_17] : memref<1x128xf32, #tpu.memory_space<vmem>>, vector<1x128xf32>
    tpu.vector_store %arg10[%c0_16, %c0_17], %29 {strides = array<i32>} : memref<1x128xf32, #tpu.memory_space<vmem>>, vector<1x128xf32>,
    %c0_18 = arith.constant 0 : index
    %c0_19 = arith.constant 0 : index
    %31 = vector.load %arg11[%c0_18, %c0_19] : memref<16x128xf32, #tpu.memory_space<vmem>>, vector<16x128xf32>
    %32 = vector.broadcast %21 : vector<1x128xf32> to vector<16x128xf32>
    %33 = arith.mulf %32, %31 : vector<16x128xf32>
    %34 = arith.truncf %24 : vector<128x128xf32> to vector<128x128xbf16>
    %cst_20 = arith.constant dense<0.000000e+00> : vector<16x128xf32>
    %35 = tpu.matmul %13, %34, %cst_20 {dimension_numbers = #tpu.dot_dimension_numbers<[1], [0], [0], [1], [0, 0, 1, 1], [], []>} : vector<16x128xbf16>, vector<128x128xbf16>, vector<16x128xf32> -> vector<16x128xf32>
    %36 = arith.addf %33, %35 : vector<16x128xf32>
    %c0_21 = arith.constant 0 : index
    %c0_22 = arith.constant 0 : index
    %37 = vector.load %arg11[%c0_21, %c0_22] : memref<16x128xf32, #tpu.memory_space<vmem>>, vector<16x128xf32>
    tpu.vector_store %arg11[%c0_21, %c0_22], %36 {strides = array<i32>} : memref<16x128xf32, #tpu.memory_space<vmem>>, vector<16x128xf32>,
    %c0_23 = arith.constant 0 : index
    %c0_24 = arith.constant 0 : index
    %38 = vector.load %arg9[%c0_23, %c0_24] : memref<1x128xf32, #tpu.memory_space<vmem>>, vector<1x128xf32>
    tpu.vector_store %arg9[%c0_23, %c0_24], %19 {strides = array<i32>} : memref<1x128xf32, #tpu.memory_space<vmem>>, vector<1x128xf32>,
    %c1_i32 = arith.constant 1 : i32
    %39 = arith.cmpi eq, %arg2, %c1_i32 : i32
    %40 = arith.extui %39 : i1 to i32
    %c0_i32_25 = arith.constant 0 : i32
    %41 = arith.cmpi ne, %40, %c0_i32_25 : i32
    scf.if %41 {
      %c0_26 = arith.constant 0 : index
      %c0_27 = arith.constant 0 : index
      %42 = vector.load %arg10[%c0_26, %c0_27] : memref<1x128xf32, #tpu.memory_space<vmem>>, vector<1x128xf32>
      %43 = tpu.reciprocal %42 {approx = true} : vector<1x128xf32> -> vector<1x128xf32>
      %c0_28 = arith.constant 0 : index
      %c0_29 = arith.constant 0 : index
      %44 = vector.load %arg11[%c0_28, %c0_29] : memref<16x128xf32, #tpu.memory_space<vmem>>, vector<16x128xf32>
      %45 = vector.broadcast %43 : vector<1x128xf32> to vector<16x128xf32>
      %46 = arith.mulf %44, %45 : vector<16x128xf32>
      %c0_30 = arith.constant 0 : index
      %c0_31 = arith.constant 0 : index
      %c0_32 = arith.constant 0 : index
      %47 = vector.load %arg7[%c0_30, %c0_31, %c0_32] : memref<1x16x128xf32, #tpu.memory_space<vmem>>, vector<1x16x128xf32>
      %48 = vector.shape_cast %47 : vector<1x16x128xf32> to vector<16x128xf32>
      %49 = vector.shape_cast %46 : vector<16x128xf32> to vector<1x16x128xf32>
      tpu.vector_store %arg7[%c0_30, %c0_31, %c0_32], %49 {strides = array<i32>} : memref<1x16x128xf32, #tpu.memory_space<vmem>>, vector<1x16x128xf32>,
    } else {
    }
    return
  }
  func.func @transform_0(%arg0: i32, %arg1: i32, %arg2: i32) -> (i32, i32, i32) {
    %c0_i32 = arith.constant 0 : i32
    %c0_i32_0 = arith.constant 0 : i32
    return %arg0, %c0_i32, %arg1 : i32, i32, i32
  }
  func.func @transform_1(%arg0: i32, %arg1: i32, %arg2: i32) -> (i32, i32, i32) {
    %c0_i32 = arith.constant 0 : i32
    %c0_i32_0 = arith.constant 0 : i32
    return %arg0, %c0_i32, %arg2 : i32, i32, i32
  }
  func.func @transform_2(%arg0: i32, %arg1: i32, %arg2: i32) -> (i32, i32) {
    %c0_i32 = arith.constant 0 : i32
    %c0_i32_0 = arith.constant 0 : i32
    %c0_i32_1 = arith.constant 0 : i32
    return %c0_i32, %c0_i32_0 : i32, i32
  }
  func.func @transform_3(%arg0: i32, %arg1: i32, %arg2: i32) -> (i32, i32) {
    %c0_i32 = arith.constant 0 : i32
    %c0_i32_0 = arith.constant 0 : i32
    %c0_i32_1 = arith.constant 0 : i32
    return %c0_i32, %c0_i32_0 : i32, i32
  }
  func.func @transform_4(%arg0: i32, %arg1: i32, %arg2: i32) -> (i32, i32, i32) {
    %c0_i32 = arith.constant 0 : i32
    %c0_i32_0 = arith.constant 0 : i32
    return %arg0, %c0_i32, %arg1 : i32, i32, i32
  }
}

</mosaic_0001>

<bundles_post_ra>
// kernel: tpu_custom_call.1
= control target key start
LH: loop header
LB: loop body
LE: loop exit
PB: predicated region body
PF: predicated region fallthrough
CT: control target
= control target key end

     0   :  { %s1776_s0 = inlined_call_operand.vmem [shape: bf16[2,16,256], index: 0, kind: input, shape index: {}]   ;;  %s1777_s1 = inlined_call_operand.hbm [shape: bf16[2,16,256], index: 1, kind: input, shape index: {}]   ;;  %s1778_s2 = inlined_call_operand.vmem [shape: bf16[32,16], index: 2, kind: input, shape index: {}]   ;;  %s1779_s3 = inlined_call_operand.vmem [shape: f32[32,1], index: 3, kind: input, shape index: {}]   ;;  %s1780_s4 = inlined_call_operand.hbm [shape: f32[2,16,256], index: 4, kind: output, shape index: {}]  }
   0x1   :  { %1787 = sst [smem:[#allocation21_spill]] %s1776_s0 }
   0x2   :  { %1788 = sst [smem:[#allocation22_spill]] %s1780_s4 }
   0x3   :  { %9 = vsyncpa [#allocation8], 0 }
   0x4   :  { %11 = vsyncpa [#allocation8 + $0x1], 0 }
   0x5   :  { %12 = vsyncpa [#allocation9], 0 }
   0x6   :  { %14 = vsyncpa [#allocation9 + $0x1], 0  ;;  %s1417_s15 = smov 0   ;;  %s1419_s16 = smov 0  }
   0x7   :  { %s1421_s17 = smov 0   ;;  %s1423_s18 = smov 0  }
   0x8   :  { %s1425_s19 = smov 0   ;;  %s1427_s20 = smov 0  }
   0x9   :  { %s1429_s21 = smov 0   ;;  %s1431_s22 = smov 0  }
   0xa   :  { %s1433_s23 = smov 0   ;;  %s1435_s24 = smov 0  }
   0xb   :  { %s1437_s25 = smov 0   ;;  %s1439_s26 = smov 0  }
   0xc   :  { %s1441_s27 = smov 0  }
   0xd LB: > { %1789 = sst [smem:[#allocation13_spill]] %s1347_s20  ;;  %s934_s28 = sadd.s32 4294967295, %s1375_s27   ;;  %s1375_s27 = sphi %s1441_s27, %s20_s27   ;;  %s1371_s26 = sphi %s1439_s26, %s1824_s26   ;;  %s1367_s25 = sphi %s1437_s25, %s1813_s25   ;;  %s1363_s24 = sphi %s1435_s24, %s1823_s24   ;;  %s1359_s23 = sphi %s1433_s23, %s1822_s23   ;;  %s1355_s22 = sphi %s1431_s22, %s1811_s22   ;;  %s1351_s21 = sphi %s1429_s21, %s1821_s21   ;;  %s1347_s20 = sphi %s1427_s20, %s1810_s20   ;;  %s1343_s19 = sphi %s1425_s19, %s1820_s19   ;;  %s1339_s18 = sphi %s1423_s18, %s1819_s18   ;;  %s1335_s17 = sphi %s1421_s17, %s1818_s17   ;;  %s1331_s16 = sphi %s1419_s16, %s1817_s16   ;;  %s1327_s15 = sphi %s1417_s15, %s1816_s15  }
   0xe   : > { %1790 = sst [smem:[#allocation14_spill]] %s1355_s22  ;;  %s32_s30 = sadd.s32 1, %s1363_s24 }
   0xf   : > { %1791 = sst [smem:[#allocation15_spill]] %s1367_s25  ;;  %s35_s5 = sadd.s32 1, %s1367_s25 }
  0x10   : > { %p33_p0 = scmp.ge.s32.totalorder %s32_s30, 2  ;;  %s39_s6 = sadd.s32 1, %s1371_s26 }
  0x11   : > { %s48_s7 = sadd.s32 1, %s1347_s20  ;;  %p55_p1 = scmp.ne.s32.totalorder %s1347_s20, %s1343_s19 }
  0x12   : > { %s1826_s30 = smov (%p33_p0, %s32_s30), 0  ;;  %s1828_s5 = smov (!%p33_p0, %s35_s5), %s1367_s25 }
  0x13   : > { %1792 = sst [smem:[#allocation16_spill]] %s1826_s30  ;;  %p56_p2 = scmp.eq.s32.totalorder %s1375_s27, 0 }
  0x14   : > { %s72_s8 = ssub.s32 %s1363_s24, %s1826_s30  ;;  %p37_p3 = scmp.ge.s32.totalorder %s1828_s5, 2 }
  0x15   : > { %s76_s9 = sadd.s32 1, %s1339_s18  ;;  %p1500_p4 = por %p56_p2, %p55_p1 }
  0x16   : > { %p83_p5 = scmp.ne.s32.totalorder %s1339_s18, %s1335_s17  ;;  %s1830_s5 = smov (%p37_p3, %s1828_s5), 0 }
  0x17   : > { %1794 = sst [smem:[#allocation17_spill]] %s1830_s5  ;;  %s1832_s6 = smov (!%p37_p3, %s39_s6), %s1371_s26 }
  0x18   : > { %s44_s11 = ssub.s32 %s1367_s25, %s1830_s5  ;;  %p1511_p6 = por %p83_p5, %p56_p2 }
  0x19   : > { %p41_p7 = scmp.ge.s32.totalorder %s1832_s6, 2  ;;  %p89_p8 = scmp.ne.s32.totalorder %s1335_s17, %s1331_s16 }
  0x1a   : > { %p90_p9 = scmp.eq.s32.totalorder %s934_s28, 0  ;;  %p157_p10 = scmp.eq.s32.totalorder %s934_s28, 7 }
  0x1b   : > { %s1834_s6 = smov (%p41_p7, %s1832_s6), 0  ;;  %p162_p13 = scmp.ne.s32.totalorder %s1343_s19, %s1327_s15 }
  0x1c   : > { %1796 = sst [smem:[#allocation18_spill]] %s1834_s6  ;;  %p1519_p11 = por %p90_p9, %p89_p8 }
  0x1d   : > { %p1526_p12 = por %p157_p10, %p55_p1  ;;  %s43_s29 = ssub.s32 %s1371_s26, %s1834_s6 }
  0x1e   : > { %s45_s5 = sor.u32 %s44_s11, %s43_s29  ;;  %s73_s30 = sor.u32 %s72_s8, %s43_s29 }
  0x1f   : > { %p46_p0 = scmp.eq.s32.totalorder %s45_s5, 0  ;;  %p74_p2 = scmp.eq.s32.totalorder %s73_s30, 0 }
  0x20   : > { %s1799_s16 = sadd.s32 4294967294, %s1375_s27   ;;  %p937_p1 = scmp.ge.s32.totalorder %s1375_s27, 8 }
  0x21   : > { %p163_p3 = scmp.eq.s32.totalorder %s1799_s16, 7 }
  0x22   : > { %s1537_s28 = scalar_select %p46_p0, %s1347_s20, %s48_s7  }
  0x23   : > { %s1540_s4 = scalar_select %p74_p2, %s1339_s18, %s76_s9  }
  0x24   : > { %1800 = sst [smem:[#allocation19_spill]] %s1537_s28  ;;  %p1542_p5 = por %p163_p3, %p162_p13 }
  0x25   : > { %1801 = sst [smem:[#allocation20_spill]] %s1540_s4  ;;  %185 = sbr.rel (%p937_p1) target bundleno = 71 (0x47), region = 24 }
  0x2a   : > { %188 = sbr.rel (!%p1500_p4) target bundleno = 53 (0x35), region = 28  ;;  %s190_s29 = sand.u32 (%p1500_p4), 1, %s1347_s20  }
  0x2b   : > { %s939_s30 = sshll.u32 (%p1500_p4), %s1371_s26, 2  ;;  %s938_s5 = sshll.u32 (%p1500_p4), %s190_s29, 3 }
  0x2c   : > { %s194_s7 = sadd.s32 (%p1500_p4), %s1367_s25, %s939_s30  ;;  %s1803_s0 = sld [smem:[#allocation21_spill]] (%p1500_p4) }
  0x2d   : > { %s940_s8 = sshll.u32 (%p1500_p4), %s194_s7, 2  ;;  %s192_s6 = scalar_lea.vmem (%p1500_p4), [#allocation6], %s938_s5 }
  0x32   : > { %s196_s16 = scalar_lea.vmem %s1803_s0, %s940_s8 }
  0x33   : > { %v213_v0 = vld [vmem:[%s196_s16] sm:$0xf]  ;;  %v215_v1 = vld [vmem:[%s196_s16 + $0x8] sm:$0xf] }
  0x34   : > { %214 = vst [vmem:[%s192_s6] sm:$0xf] %v213_v0  ;;  %216 = vst [vmem:[%s192_s6 + $0x4] sm:$0xf] %v215_v1 }
  0x35 PF: > { %s245_s10 = sand.u32 1, %s1339_s18   ;;  %s942_s28 = sshll.u32 %s1371_s26, 2 }
  0x36   : > { %s941_s20 = sshll.u32 %s245_s10, 3  ;;  %s254_s29 = sadd.s32 %s1363_s24, %s942_s28 }
  0x37   : > { %s943_s30 = sshll.u32 %s254_s29, 6  ;;  %s249_s7 = scalar_lea.vmem [#allocation7], %s941_s20 }
  0x38   : > { %s257_s25 = sshll.u32 %s249_s7, 4  ;;  %s256_s8 = scalar_lea.hbm %s1777_s1, %s943_s30  ;;  %s258_s25 = int_to_ptr.vmem [resolvable:$true] %s257_s25 }
  0x39   : > { %s246_s5 = scalar_lea.sflag [#allocation8], %s245_s10  ;;  %s1225_s11 = scalar_lea.vmem %s258_s25, 128 }
  0x3a   : > { %p1226_p4 = scmp.ne.s32.totalorder %s258_s25, %s1225_s11  ;;  %s1377_s6 = smov [#allocation7]  }
  0x3b   : > { %s1229_s16 = sshll.u32 %s1377_s6, 4  ;;  %s1230_s16 = int_to_ptr.vmem [resolvable:$false] %s1229_s16 }
  0x3c   : > { %p1227_p7 = pnand %p1226_p4, %p1511_p6  ;;  %s1231_s0 = scalar_lea.vmem %s1230_s16, 256 }
  0x3d   : > { %p1232_p9 = scmp.lt.s32.totalorder %s258_s25, %s1230_s16  ;;  %p1233_p10 = scmp.lt.s32.totalorder %s1231_s0, %s1225_s11 }
  0x3e   : > { %p1228_p8 = pneg %p1227_p7 }
  0x3f   : > { %p1234_p13 = por %p1233_p10, %p1232_p9 }
  0x41   : > { %p1235_p0 = pnand %p1234_p13, %p1228_p8 }
  0x43   : > { %1238 = shalt.err (!%p1235_p0)
}
  0x44   : > { %s1378_s20 = smov 128   ;;  %s1379_s4 = smov 64  }
  0x45   : > { %s1380_s28 = smov 4  }
  0x46   : > { %1044 = dma.hbm_to_vmem [thread:$0]  (%p1511_p6), %s256_s8, 128, %s258_s25, %s246_s5, %s1378_s20, %s1379_s4, %s1380_s28  }
  0x47 PF: > { %p944_p2 = scmp.ge.s32.totalorder %s1375_s27, 1  ;;  %p265_p3 = scmp.lt.s32.totalorder %s1375_s27, 9 }
  0x49   : > { %p266_p1 = pnand %p944_p2, %p265_p3 }
  0x4a   : > { %s1568_s0 = sand.u32 (!%p266_p1), 1, %s1343_s19   ;;  %s278_s10 = sand.u32 (!%p266_p1), 1, %s1335_s17  }
  0x4b   : > { %269 = sbr.rel (%p266_p1) target bundleno = 1155 (0x483), region = 73  ;;  %s945_s29 = sshll.u32 (!%p266_p1), %s1568_s0, 3 }
  0x4c   : > { %s1572_s30 = sshll.u32 (!%p266_p1), %s278_s10, 3  ;;  %s274_s12 = scalar_lea.vmem (!%p266_p1), [#allocation6], %s945_s29 }
  0x4d   : > { %s279_s25 = scalar_lea.sflag (!%p266_p1), [#allocation8], %s278_s10  ;;  %s282_s7 = scalar_lea.vmem (!%p266_p1), [#allocation7], %s1572_s30 }
  0x50   : > { %1318 = dma.done.wait (%p1519_p11), %s279_s25, 128  }
  0x51   : > { %1320 = vsyncadd (%p1519_p11), %s279_s25, 4294967168  ;;  %s947_s9 = sshll.u32 %s1568_s0, 4  ;;  %p948_p6 = scmp.ne.s32.totalorder %s1351_s21, 0 }
  0x52   : > { %s1580_s8 = scalar_lea.vmem [#allocation10], %s947_s9 }
  0x53   : > { %315 = sbr.rel (%p948_p6) target bundleno = 292 (0x124), region = 85 }
  0x58   : > { %v1171_v2 = vld [vmem:[%s274_s12] sm:$0xff]   ;;  %v1381_v3 = vmov -1e+30   ;;  %v1382_v4 = vmov 0.0   ;;  %vm1383_vm0 = vmmov 0   ;;  %vm335_vm1 = vcmask 130048  }
  0x59   : > { %316 = vst [vmem:[#allocation3] sm:$0x1] %v1381_v3  ;;  %317 = vst [vmem:[#allocation4] sm:$0x1] %v1382_v4  ;;  %993 = vmatprep.subr.bf16.mxu0 %v1382_v4  ;;  %995 = vmatprep.mubr.msk.bf16.mxu0 %vm1383_vm0, %v1382_v4  ;;  %v320_v5 = vld [vmem:[%s1778_s2 + $0xc] sm:$0xf] }
  0x5a   : > { %318 = vst [vmem:[#allocation5] sm:$0xff] %v1382_v4  ;;  %319 = vst [vmem:[#allocation5 + $0x8] sm:$0xff] %v1382_v4  ;;  %994 = vmatpush3.bf16.msra.mxu0 %v1171_v2  ;;  %v323_v6 = vld [vmem:[%s1779_s3 + $0x18] sm:$0xff]  ;;  %v1384_v7 = vmov 0  }
  0x5b   : > { %1170 = vset.pattern.permute.xlu0 %v1384_v7 }
  0x5c   : > { %326 = vperm.xlu0 %1170, %v323_v6  }
  0x5d   : > { %996 = vmatmul.mubr.msk.bf16.vlgmr.msra.gmra.mxu0 %vm335_vm1, %v320_v5 }
  0xd7   : > { %v327_v8 = vpop.permute.xlu0 %326 }
 0x11d   : > { %v373_v9 = vpop.f32.mrf.mxu0 }
 0x11e   : > { %v374_v10 = vadd.f32 %v373_v9, %v327_v8 }
 0x11f   : > { %v997_v11 = vpop.f32.mrf.mxu0 }
 0x120   : > { %v379_v12 = vpack.c.bf16 %v374_v10, %v374_v10 }
 0x121   : > { %v376_v13 = vpop.f32.mrf.mxu0 }
 0x122   : > { %380 = vst [vmem:[#allocation2] sm:$0xf] %v379_v12 }
 0x123   : > { %v998_v14 = vpop.f32.mrf.mxu0 }
 0x124 PF: > { %v1174_v15 = vld [vmem:[%s282_s7] sm:$0xff]   ;;  %vm418_vm2 = vcmask 130048   ;;  %v1385_v18 = vmov 0   ;;  %vm517_vm3 = vcmask 1043456   ;;  %vm492_vm4 = vcmask 64512   ;;  %p964_p11 = scmp.ne.s32.totalorder %s1351_s21, 1 }
 0x125   : > { %v1175_v16 = vld [vmem:[%s1778_s2] sm:$0xff]   ;;  %999 = vmatprep.subr.bf16.mxu0 %v1174_v15  ;;  %v1176_v17 = vld [vmem:[%s1778_s2 + $0x8] ss:$0 sps:$4 sm:$0xff]   ;;  %1173 = vset.pattern.permute.xlu1 %v1385_v18  ;;  %v388_v21 = vld [vmem:[%s1779_s3 + $0x10] sm:$0xff]  ;;  %v1386_v38 = vmov 0.0   ;;  %vm1387_vm5 = vmmov 0   ;;  %v645_v8 = vlaneseq }
 0x126   : > { %v387_v19 = vld [vmem:[%s1779_s3 + $0x8] sm:$0xff]  ;;  %1000 = vmatpush3.bf16.msra.mxu0 %v1174_v15  ;;  %1001 = vmatprep.mubr.msk.bf16.mxu0 %vm418_vm2, %v1175_v16  ;;  %v386_v20 = vld [vmem:[%s1779_s3] sm:$0xff] }
 0x127   : > { %396 = vperm.xlu1 %1173, %v387_v19   ;;  %1172 = vset.pattern.permute.xlu0 %v1385_v18  ;;  %v646_v11 = vshrl.u32 %v645_v8, 7  ;;  %v618_v13 = vld [vmem:[#allocation3] sm:$0x1] }
 0x128   : > { %391 = vperm.xlu0 %1172, %v386_v20   ;;  %1023 = vmatprep.subr.bf16.mxu0 %v1386_v38 }
 0x129   : > { %1002 = vmatmul.mubr.msk.bf16.vlgmr.msra.gmra.mxu0 %vm418_vm2, %v1176_v17  ;;  %v475_v22 = vld [vmem:[#allocation2] sm:$0xf]  ;;  %v1648_v15 = vsub.s32 0, %v646_v11 }
 0x12a   : > { %1043 = vmatprep.subr.msk.bf16.mxu1 %vm517_vm3, %v475_v22  ;;  %v519_v23 = vsel %vm517_vm3, %v475_v22, 0  ;;  %1039 = vmatprep.mubr.msk.bf16.mxu0 %vm1387_vm5, %v1386_v38 }
 0x12b   : > { %401 = vperm.xlu1 %1173, %v388_v21   ;;  %1006 = vmatpush3.bf16.msra.mxu1 %v519_v23 }
 0x1a3   : > { %v392_v25 = vpop.permute.xlu0 %391 }
 0x1e9   : > { %v1606_v24 = vpop.f32.mrf.mxu0 }
 0x1eb   : > { %v459_v26 = vpop.f32.mrf.mxu0 }
 0x1ec   : > { %v460_v27 = vadd.f32 %v459_v26, %v392_v25 }
 0x1ed   : > { %v1004_v28 = vpop.f32.mrf.mxu0 }
 0x1ee   : > { %v473_v29 = vpack.c.bf16 %v460_v27, %v460_v27 }
 0x1f0   : > { %476 = vxpose.xlu0.c.b16.start.end [1/1] (short) %v473_v29, 128 }
 0x252   : > { %v484_v30 = vpop.trf.xlu0 }
 0x253   : > { %1007 = vmatprep.mubr.msk.bf16.mxu1 %vm492_vm4, %v484_v30 }
 0x256   : > { %v485_v31 = vpop.trf.xlu0 }
 0x257   : > { %1008 = vmatmul.mubr.msk.bf16.vlgmr.msra.gmra.mxu1 %vm492_vm4, %v485_v31 }
 0x25a   : > { %v486_v32 = vpop.trf.xlu0 }
 0x25b   : > { %1011 = vmatprep.mubr.msk.bf16.mxu1 %vm492_vm4, %v486_v32 }
 0x25e   : > { %v487_v33 = vpop.trf.xlu0 }
 0x25f   : > { %1012 = vmatmul.mubr.msk.bf16.gmra.mxu1 %vm492_vm4, %v487_v33 }
 0x262   : > { %v488_v34 = vpop.trf.xlu0 }
 0x263   : > { %1015 = vmatprep.mubr.msk.bf16.mxu1 %vm492_vm4, %v488_v34 }
 0x266   : > { %v489_v35 = vpop.trf.xlu0 }
 0x267   : > { %1016 = vmatmul.mubr.msk.bf16.gmra.mxu1 %vm492_vm4, %v489_v35 }
 0x26a   : > { %v490_v36 = vpop.trf.xlu0 }
 0x26b   : > { %1019 = vmatprep.mubr.msk.bf16.mxu1 %vm492_vm4, %v490_v36 }
 0x26e   : > { %v491_v37 = vpop.trf.xlu0 }
 0x26f   : > { %1020 = vmatmul.mubr.msk.bf16.gmra.mxu1 %vm492_vm4, %v491_v37 }
 0x317   : > { %v1009_v39 = vpop.f32.mrf.mxu1 }
 0x319   : > { %v555_v40 = vpop.f32.mrf.mxu1 }
 0x31b   : > { %v1010_v41 = vpop.f32.mrf.mxu1 }
 0x31d   : > { %v558_v42 = vpop.f32.mrf.mxu1 }
 0x31f   : > { %v1618_v43 = vpop.f32.mrf.mxu1 }
 0x320   : > { %v621_v54 = vmax.f32 %v1009_v39, %v1618_v43 }
 0x321   : > { %v571_v44 = vpop.f32.mrf.mxu1 }
 0x322   : > { %v619_v55 = vmax.f32 %v555_v40, %v571_v44 }
 0x323   : > { %v1620_v45 = vpop.f32.mrf.mxu1 }
 0x324   : > { %v622_v52 = vmax.f32 %v1010_v41, %v1620_v45 }
 0x325   : > { %v574_v46 = vpop.f32.mrf.mxu1 }
 0x326   : > { %v620_v56 = vmax.f32 %v558_v42, %v574_v46 }
 0x327   : > { %v1622_v47 = vpop.f32.mrf.mxu1 }
 0x328   : > { %v625_v59 = vmax.f32 %v621_v54, %v1622_v47 }
 0x329   : > { %v1624_v48 = vpop.f32.mrf.mxu1 }
 0x32a   : > { %v623_v60 = vmax.f32 %v619_v55, %v1624_v48 }
 0x32b   : > { %v1626_v49 = vpop.f32.mrf.mxu1 }
 0x32c   : > { %v626_v57 = vmax.f32 %v622_v52, %v1626_v49 }
 0x32d   : > { %v1628_v50 = vpop.f32.mrf.mxu1 }
 0x32e   : > { %v624_v61 = vmax.f32 %v620_v56, %v1628_v50 }
 0x32f   : > { %v1630_v51 = vpop.f32.mrf.mxu1 }
 0x330   : > { %v629_v0 = vmax.f32 %v625_v59, %v1630_v51 }
 0x331   : > { %v1633_v53 = vpop.f32.mrf.mxu1 }
 0x332   : > { %v627_v1 = vmax.f32 %v623_v60, %v1633_v53 }
 0x333   : > { %v1637_v58 = vpop.f32.mrf.mxu1 }
 0x334   : > { %v630_v62 = vmax.f32 %v626_v57, %v1637_v58 }
 0x335   : > { %v1643_v63 = vpop.f32.mrf.mxu1 }
 0x336   : > { %v628_v2 = vmax.f32 %v624_v61, %v1643_v63  ;;  %v632_v3 = vmax.f32 %v629_v0, %v630_v62 }
 0x338   : > { %v631_v4 = vmax.f32 %v627_v1, %v628_v2 }
 0x33a   : > { %v633_v5 = vmax.f32 %v631_v4, %v632_v3 }
 0x33c   : > { %v634_v6 = vrot.slane %v633_v5, 4 }
 0x33e   : > { %v635_v7 = vmax.f32 %v633_v5, %v634_v6 }
 0x340   : > { %v636_v9 = vrot.slane %v635_v7, 2 }
 0x342   : > { %v637_v10 = vmax.f32 %v635_v7, %v636_v9 }
 0x344   : > { %v638_v12 = vrot.slane %v637_v10, 1 }
 0x346   : > { %v639_v14 = vmax.f32 %v637_v10, %v638_v12 }
 0x348   : > { %v640_v16 = vmax.f32 %v618_v13, %v639_v14 }
 0x34a   : > { %v641_v17 = vsub.f32 %v618_v13, %v640_v16  ;;  %v648_v18 = vrot.slane %v640_v16, %v1648_v15  ;;  %786 = vst [vmem:[#allocation3] sm:$0x1] %v640_v16 }
 0x34c   : > { %v642_v19 = vmul.f32 1.442695, %v641_v17  ;;  %v650_v20 = vsub.f32 %v555_v40, %v648_v18  ;;  %v651_v21 = vsub.f32 %v558_v42, %v648_v18  ;;  %v652_v22 = vsub.f32 %v1009_v39, %v648_v18 }
 0x34d   : > { %v653_v23 = vsub.f32 %v1010_v41, %v648_v18  ;;  %v654_v27 = vsub.f32 %v571_v44, %v648_v18  ;;  %v655_v29 = vsub.f32 %v574_v46, %v648_v18  ;;  %v656_v31 = vsub.f32 %v1618_v43, %v648_v18 }
 0x34e   : > { %1177 = vpow2.f32 %v642_v19  ;;  %v666_v25 = vmul.f32 1.442695, %v650_v20  ;;  %v668_v26 = vmul.f32 1.442695, %v651_v21  ;;  %v670_v28 = vmul.f32 1.442695, %v652_v22 }
 0x34f   : > { %v672_v30 = vmul.f32 1.442695, %v653_v23  ;;  %v657_v32 = vsub.f32 %v1620_v45, %v648_v18  ;;  %v674_v33 = vmul.f32 1.442695, %v654_v27  ;;  %v658_v34 = vsub.f32 %v1624_v48, %v648_v18 }
 0x350   : > { %1179 = vpow2.f32 %v666_v25  ;;  %v659_v35 = vsub.f32 %v1628_v50, %v648_v18  ;;  %v676_v36 = vmul.f32 1.442695, %v655_v29  ;;  %v664_v37 = vsub.f32 %v1630_v51, %v648_v18 }
 0x351   : > { %1181 = vpow2.f32 %v668_v26  ;;  %v678_v39 = vmul.f32 1.442695, %v656_v31  ;;  %v665_v40 = vsub.f32 %v1637_v58, %v648_v18  ;;  %v680_v41 = vmul.f32 1.442695, %v657_v32  ;;  %v397_v32 = vpop.permute.xlu1 %396 }
 0x352   : > { %1183 = vpow2.f32 %v670_v28  ;;  %v662_v42 = vsub.f32 %v1633_v53, %v648_v18  ;;  %v682_v43 = vmul.f32 1.442695, %v658_v34  ;;  %v663_v45 = vsub.f32 %v1643_v63, %v648_v18 }
 0x353   : > { %1185 = vpow2.f32 %v672_v30  ;;  %v684_v46 = vmul.f32 1.442695, %v659_v35  ;;  %v694_v48 = vmul.f32 1.442695, %v664_v37  ;;  %v660_v51 = vsub.f32 %v1622_v47, %v648_v18  ;;  %v462_v37 = vpop.f32.mrf.mxu0 }
 0x354   : > { %1187 = vpow2.f32 %v674_v33  ;;  %v696_v52 = vmul.f32 1.442695, %v665_v40  ;;  %v690_v54 = vmul.f32 1.442695, %v662_v42  ;;  %v661_v55 = vsub.f32 %v1626_v49, %v648_v18 }
 0x355   : > { %1189 = vpow2.f32 %v676_v36  ;;  %v692_v56 = vmul.f32 1.442695, %v663_v45  ;;  %v686_v58 = vmul.f32 1.442695, %v660_v51  ;;  %v698_v36 = vld [vmem:[#allocation4] sm:$0x1]  ;;  %v463_v45 = vadd.f32 %v462_v37, %v397_v32 }
 0x356   : > { %1191 = vpow2.f32 %v678_v39  ;;  %v688_v47 = vmul.f32 1.442695, %v661_v55 }
 0x357   : > { %1193 = vpow2.f32 %v680_v41  ;;  %v402_v41 = vpop.permute.xlu1 %401 }
 0x358   : > { %1195 = vpow2.f32 %v682_v43  ;;  %v468_v51 = vadd.f32 %v1606_v24, %v402_v41 }
 0x359   : > { %1197 = vpow2.f32 %v684_v46 }
 0x35a   : > { %1199 = vpow2.f32 %v694_v48 }
 0x35b   : > { %v1658_v44 = vpop.eup %1177  ;;  %1201 = vpow2.f32 %v696_v52  ;;  %v474_v52 = vpack.c.bf16 %v468_v51, %v463_v45 }
 0x35c   : > { %v1663_v50 = vrot.slane %v1658_v44, %v1648_v15  ;;  %1203 = vpow2.f32 %v690_v54  ;;  %v699_v42 = vmul.f32 %v1658_v44, %v698_v36  ;;  %v723_v54 = vld [vmem:[#allocation5] sm:$0xff]  ;;  %v724_v44 = vld [vmem:[#allocation5 + $0x8] sm:$0xff] }
 0x35d   : > { %v1666_v53 = vpop.eup %1179  ;;  %1205 = vpow2.f32 %v692_v56 }
 0x35e   : > { %v1669_v57 = vpop.eup %1181  ;;  %1207 = vpow2.f32 %v686_v58  ;;  %v731_v55 = vmul.f32 %v1663_v50, %v723_v54 }
 0x35f   : > { %v700_v59 = vadd.f32 %v1669_v57, %v1666_v53  ;;  %v1673_v60 = vpop.eup %1183  ;;  %1209 = vpow2.f32 %v688_v47  ;;  %v733_v48 = vpack.c.bf16 %v1669_v57, %v1666_v53 }
 0x360   : > { %v1186_v62 = vpop.eup %1185 }
 0x361   : > { %v701_v61 = vadd.f32 %v1673_v60, %v700_v59  ;;  %v1188_v63 = vpop.eup %1187  ;;  %v734_v40 = vpack.c.bf16 %v1186_v62, %v1673_v60 }
 0x362   : > { %v1190_v1 = vpop.eup %1189 }
 0x363   : > { %v702_v49 = vadd.f32 %v1186_v62, %v701_v61  ;;  %v1192_v2 = vpop.eup %1191  ;;  %v735_v34 = vpack.c.bf16 %v1190_v1, %v1188_v63 }
 0x364   : > { %v1194_v4 = vpop.eup %1193 }
 0x365   : > { %v703_v0 = vadd.f32 %v1188_v63, %v702_v49  ;;  %v1196_v5 = vpop.eup %1195  ;;  %v736_v30 = vpack.c.bf16 %v1194_v4, %v1192_v2 }
 0x366   : > { %v1198_v7 = vpop.eup %1197 }
 0x367   : > { %v704_v3 = vadd.f32 %v1190_v1, %v703_v0  ;;  %v1200_v8 = vpop.eup %1199  ;;  %v737_v27 = vpack.c.bf16 %v1198_v7, %v1196_v5 }
 0x368   : > { %v1202_v10 = vpop.eup %1201 }
 0x369   : > { %v705_v6 = vadd.f32 %v1192_v2, %v704_v3  ;;  %v1204_v11 = vpop.eup %1203  ;;  %v740_v13 = vpack.c.bf16 %v1202_v10, %v1200_v8 }
 0x36a   : > { %v1206_v14 = vpop.eup %1205 }
 0x36b   : > { %v706_v9 = vadd.f32 %v1194_v4, %v705_v6  ;;  %1024 = vmatpush3.bf16.msra.mxu0 %v740_v13  ;;  %v1208_v17 = vpop.eup %1207  ;;  %v739_v19 = vpack.c.bf16 %v1206_v14, %v1204_v11 }
 0x36c   : > { %1025 = vmatprep.subr.bf16.mxu0 %v1386_v38  ;;  %v1210_v20 = vpop.eup %1209 }
 0x36d   : > { %v707_v12 = vadd.f32 %v1196_v5, %v706_v9  ;;  %v738_v23 = vpack.c.bf16 %v1210_v20, %v1208_v17 }
 0x36f   : > { %v708_v16 = vadd.f32 %v1198_v7, %v707_v12  ;;  %1026 = vmatpush3.bf16.msra.mxu0 %v739_v19 }
 0x370   : > { %1027 = vmatprep.subr.bf16.mxu0 %v1386_v38 }
 0x371   : > { %v709_v18 = vadd.f32 %v1208_v17, %v708_v16 }
 0x373   : > { %v710_v21 = vadd.f32 %v1210_v20, %v709_v18  ;;  %1028 = vmatpush3.bf16.msra.mxu0 %v738_v23 }
 0x374   : > { %1029 = vmatprep.subr.bf16.mxu0 %v1386_v38 }
 0x375   : > { %v711_v22 = vadd.f32 %v1204_v11, %v710_v21 }
 0x377   : > { %v712_v25 = vadd.f32 %v1206_v14, %v711_v22  ;;  %1030 = vmatpush3.bf16.msra.mxu0 %v737_v27 }
 0x378   : > { %1031 = vmatprep.subr.bf16.mxu0 %v1386_v38 }
 0x379   : > { %v713_v26 = vadd.f32 %v1200_v8, %v712_v25 }
 0x37b   : > { %v714_v28 = vadd.f32 %v1202_v10, %v713_v26  ;;  %1032 = vmatpush3.bf16.msra.mxu0 %v736_v30 }
 0x37c   : > { %1033 = vmatprep.subr.bf16.mxu0 %v1386_v38 }
 0x37d   : > { %v715_v29 = vrot.slane %v714_v28, 4 }
 0x37f   : > { %v716_v31 = vadd.f32 %v715_v29, %v714_v28  ;;  %1034 = vmatpush3.bf16.msra.mxu0 %v735_v34 }
 0x380   : > { %1035 = vmatprep.subr.bf16.mxu0 %v1386_v38 }
 0x381   : > { %v717_v33 = vrot.slane %v716_v31, 2 }
 0x383   : > { %v718_v35 = vadd.f32 %v717_v33, %v716_v31  ;;  %1036 = vmatpush3.bf16.msra.mxu0 %v734_v40 }
 0x384   : > { %1037 = vmatprep.subr.bf16.mxu0 %v1386_v38  ;;  %v732_v38 = vmul.f32 %v1663_v50, %v724_v44 }
 0x385   : > { %v719_v39 = vrot.slane %v718_v35, 1 }
 0x387   : > { %v720_v43 = vadd.f32 %v719_v39, %v718_v35  ;;  %1038 = vmatpush3.bf16.msra.mxu0 %v733_v48 }
 0x389   : > { %v721_v46 = vadd.f32 %v720_v43, %v699_v42 }
 0x38a   : > { %1040 = vmatmul.mubr.bf16.vlgmr.msra.gmra.mxu0 %v474_v52 }
 0x38b   : > { %722 = vst [vmem:[#allocation4] sm:$0x1] %v721_v46 }
 0x44a   : > { %v775_v56 = vpop.f32.mrf.mxu0 }
 0x44b   : > { %v782_v58 = vadd.f32 %v775_v56, %v731_v55 }
 0x44c   : > { %v1041_v59 = vpop.f32.mrf.mxu0 }
 0x44d   : > { %784 = vst [vmem:[#allocation5] sm:$0xff] %v782_v58  ;;  %790 = sbr.rel (%p964_p11) target bundleno = 1126 (0x466), region = 89 }
 0x44e   : > { %v778_v60 = vpop.f32.mrf.mxu0 }
 0x44f   : > { %v783_v47 = vadd.f32 %v778_v60, %v732_v38 }
 0x450   : > { %v1042_v61 = vpop.f32.mrf.mxu0 }
 0x451   : > { %785 = vst [vmem:[#allocation5 + $0x8] sm:$0xff] %v783_v47 }
 0x452   : > { %v791_v24 = vld [vmem:[#allocation4] sm:$0x1] }
 0x453   : > { %1211 = vrcp.f32 %v791_v24 }
 0x454   : > { %v793_v57 = vld [vmem:[#allocation5] sm:$0xff] }
 0x458   : > { %v794_v62 = vld [vmem:[#allocation5 + $0x8] sm:$0xff] }
 0x460   : > { %v1212_v53 = vpop.eup %1211 }
 0x461   : > { %v799_v49 = vrot.slane %v1212_v53, %v1648_v15 }
 0x463   : > { %v801_v63 = vmul.f32 %v799_v49, %v793_v57  ;;  %v802_v0 = vmul.f32 %v799_v49, %v794_v62 }
 0x465   : > { %803 = vst [vmem:[%s1580_s8] sm:$0xff] %v801_v63  ;;  %804 = vst [vmem:[%s1580_s8 + $0x8] sm:$0xff] %v802_v0 }
 0x466 PF: > { %s1804_s9 = sld [smem:[#allocation14_spill]]  ;;  %s966_s21 = sshll.u32 %s1359_s23, 2 }
 0x467   : > { %s820_s5 = sshll.u32 %s1580_s8, 4  ;;  %s1805_s20 = sld [smem:[#allocation22_spill]]  ;;  %s1697_s5 = int_to_ptr.vmem [resolvable:$true] %s820_s5 }
 0x468   : > { %s806_s10 = scalar_lea.sflag [#allocation9], %s1568_s0  ;;  %s1239_s29 = scalar_lea.vmem %s1697_s5, 256 }
 0x469   : > { %p1240_p4 = scmp.ne.s32.totalorder %s1697_s5, %s1239_s29  ;;  %s1388_s23 = smov [#allocation10]  }
 0x46a   : > { %s1243_s30 = sshll.u32 %s1388_s23, 4  ;;  %s1244_s30 = int_to_ptr.vmem [resolvable:$false] %s1243_s30 }
 0x46b   : > { %p1241_p7 = pnand %p1240_p4, %p1526_p12  ;;  %s1245_s8 = scalar_lea.vmem %s1244_s30, 512 }
 0x46c   : > { %s817_s13 = sadd.s32 %s1804_s9, %s966_s21  ;;  %p1246_p9 = scmp.lt.s32.totalorder %s1697_s5, %s1244_s30 }
 0x46d   : > { %s967_s11 = sshll.u32 %s817_s13, 7  ;;  %s1806_s4 = smov %s1805_s20 }
 0x46e   : > { %s1702_s28 = scalar_lea.hbm %s1805_s20, %s967_s11  ;;  %p1242_p8 = pneg %p1241_p7 }
 0x46f   : > { %p1247_p10 = scmp.lt.s32.totalorder %s1245_s8, %s1239_s29 }
 0x471   : > { %p1248_p13 = por %p1247_p10, %p1246_p9 }
 0x473   : > { %p1249_p0 = pnand %p1248_p13, %p1242_p8 }
 0x475   : > { %1252 = shalt.err (!%p1249_p0)
}
 0x476   : > { %s1253_s12 = scalar_lea.hbm %s1702_s28, 256  ;;  %s1257_s9 = scalar_lea.hbm %s1806_s4, 1024 }
 0x477   : > { %p1254_p2 = scmp.ne.s32.totalorder %s1702_s28, %s1253_s12  ;;  %p1258_p6 = scmp.lt.s32.totalorder %s1702_s28, %s1806_s4 }
 0x478   : > { %p1259_p11 = scmp.lt.s32.totalorder %s1257_s9, %s1253_s12 }
 0x479   : > { %p1255_p3 = pnand %p1254_p2, %p1526_p12 }
 0x47a   : > { %p1260_p4 = por %p1259_p11, %p1258_p6 }
 0x47b   : > { %p1256_p1 = pneg %p1255_p3 }
 0x47d   : > { %p1261_p7 = pnand %p1260_p4, %p1256_p1 }
 0x47f   : > { %1264 = shalt.err (!%p1261_p7)
}
 0x480   : > { %s1389_s11 = smov 128   ;;  %s1390_s6 = smov 256  }
 0x481   : > { %s1391_s16 = smov 8  }
 0x482   : > { %1046 = dma.vmem_to_hbm [thread:$0]  (%p1526_p12), %s1697_s5, 256, %s1702_s28, %s806_s10, %s1389_s11, %s1390_s6, %s1391_s16  }
 0x483 PF: > { %p1052_p8 = scmp.ge.s32.totalorder %s1375_s27, 2  ;;  %s835_s20 = sand.u32 1, %s1327_s15  }
 0x484   : > { %s836_s29 = scalar_lea.sflag [#allocation9], %s835_s20 }
 0x485   : > { %p1049_p9 = pnand %p1052_p8, %p1542_p5 }
 0x487   : > { %p1050_p10 = pneg %p1049_p9 }
 0x489   : > { %1322 = dma.done.wait (%p1050_p10), %s836_s29, 256  }
 0x48a   : > { %1324 = vsyncadd (%p1050_p10), %s836_s29, 4294967040  ;;  %s20_s27 = sadd.s32 1, %s1375_s27   ;;  %s1808_s14 = sld [smem:[#allocation20_spill]] }
 0x48b   : > { %p1732_p13 = scmp.ge.s32.totalorder %s20_s27, 10   ;;  %s1809_s0 = sld [smem:[#allocation13_spill]] }
 0x48c   : > { %s1810_s20 = sld [smem:[#allocation19_spill]]  ;;  %s1816_s15 = smov %s1343_s19 }
 0x48d   : > { %s1811_s22 = sld [smem:[#allocation15_spill]]  ;;  %s1817_s16 = smov %s1335_s17 }
 0x48e   : > { %s1812_s5 = sld [smem:[#allocation16_spill]]  ;;  %s1818_s17 = smov %s1339_s18 }
 0x48f   : > { %s1813_s25 = sld [smem:[#allocation17_spill]]  ;;  %s1821_s21 = smov %s1363_s24 }
 0x490   : > { %s1814_s28 = sld [smem:[#allocation18_spill]]  ;;  %s1819_s18 = smov %s1808_s14 }
 0x491   : > { %s1820_s19 = smov %s1809_s0  ;;  %s1822_s23 = smov %s1371_s26 }
 0x492   :  { %19 = sbr.rel (!%p1732_p13) target bundleno = 13 (0xd), region = 138 }
 0x494   : > { %s1823_s24 = smov %s1812_s5 }
 0x496   : > { %s1824_s26 = smov %s1814_s28 }
 0x497   :  { %841 = vsyncpa [#allocation8], 1 }
 0x498   :  { %843 = vsyncpa [#allocation8 + $0x1], 1 }
 0x499   :  { %844 = vsyncpa [#allocation9], 1 }
 0x49a   :  { %846 = vsyncpa [#allocation9 + $0x1], 1 }

</bundles_post_ra>
